<compile_context>
chip_gen: v5e
topology: v5e:2x2
jax: 0.10.0
libtpu: 0.0.40
codegen_flags: <defaults>
</compile_context>

<pallas_src>
import jax
import jax.numpy as jnp
import numpy as np
from jax import lax
from jax.experimental import pallas as pl
from jax.experimental.pallas import tpu as pltpu

MAX_TILE_ROWS = 512  # upper bound on sequence-tile rows per grid step


def _seq_embed_kernel(ids_ref, word_ref, pos_ref, out_ref):
    # ids_ref : VMEM (TS, 1) int32   (token ids for this sequence tile)
    # word_ref: VMEM (V, D)  f32     (full word-embedding table, resident)
    # pos_ref : VMEM (TS, D) f32     (positional rows for this tile)
    # out_ref : VMEM (TS, D) f32
    ts = ids_ref.shape[0]
    v = word_ref.shape[0]

    ids = ids_ref[...]                                            # (TS, 1)
    vocab_iota = lax.broadcasted_iota(jnp.int32, (ts, v), 1)      # (TS, V)
    onehot = (ids == vocab_iota).astype(word_ref.dtype)           # (TS, V)

    gathered = jnp.dot(onehot, word_ref[...],
                       preferred_element_type=jnp.float32)        # (TS, D) on MXU
    out_ref[...] = (gathered + pos_ref[...].astype(jnp.float32)).astype(out_ref.dtype)


def _pick_tile(seq_len):
    """Largest sequence tile: whole sequence if it fits, else a multiple of 8 dividing S."""
    if seq_len <= MAX_TILE_ROWS:
        return seq_len
    for ts in range(MAX_TILE_ROWS, 7, -8):
        if seq_len % ts == 0:
            return ts
    return seq_len  # fall back to a single (possibly large) tile


def sequence_embedding(x, word_emb, pos_emb):
    """x: (1, S) int32; word_emb: (V, D); pos_emb: (L, D). Returns (S, D)."""
    assert x.shape[0] == 1, "SequenceEmbedding only supports batch size 1"
    S = x.shape[1]
    V, D = word_emb.shape
    L, _ = pos_emb.shape
    assert S <= L, "sequence longer than position-embedding table"

    ts = _pick_tile(S)
    grid = (S // ts,)

    ids = x[0].astype(jnp.int32).reshape(S, 1)  # (S, 1) int32, VMEM input

    # Explicit VMEM budget: double-buffered word table + pos/out tiles + ids, plus headroom.
    itemsize = jnp.dtype(word_emb.dtype).itemsize
    vmem_bytes = (2 * V * D * itemsize          # word table (pipeline buffers)
                  + 4 * ts * D * itemsize       # pos + out, double-buffered
                  + 2 * ts * 4                  # ids
                  + (1 << 20))                  # headroom
    vmem_limit = int(min(64 << 20, max(vmem_bytes, 4 << 20)))

    return pl.pallas_call(
        _seq_embed_kernel,
        out_shape=jax.ShapeDtypeStruct((S, D), word_emb.dtype),
        grid=grid,
        in_specs=[
            pl.BlockSpec((ts, 1), lambda i: (i, 0)),   # token ids for this tile
            pl.BlockSpec((V, D), lambda i: (0, 0)),    # full word table, constant index
            pl.BlockSpec((ts, D), lambda i: (i, 0)),   # positional rows [i*ts, (i+1)*ts)
        ],
        out_specs=pl.BlockSpec((ts, D), lambda i: (i, 0)),
        compiler_params=pltpu.CompilerParams(
            dimension_semantics=("parallel",),         # independent tiles -> megacore on v7x
            vmem_limit_bytes=vmem_limit,
        ),
    )(ids, word_emb, pos_emb)


if __name__ == "__main__":
    vocab_size = 32
    max_len = 16
    embedding_dim = 128
    seq_len = 16

    key = jax.random.PRNGKey(0)
    k_word, k_pos, k_ids = jax.random.split(key, 3)

    # Deterministic parameter init (mirrors torch.randn shapes in __init__).
    word_emb = jax.random.normal(k_word, (vocab_size, embedding_dim), jnp.float32)
    pos_emb = jax.random.normal(k_pos, (max_len, embedding_dim), jnp.float32)

    # Token ids, batch size 1.
    x = jax.random.randint(k_ids, (1, seq_len), 0, vocab_size, jnp.int32)

    out = sequence_embedding(x, word_emb, pos_emb)
    out = jax.block_until_ready(out)

    # Pure-JAX reference of the PyTorch forward.
    ref = word_emb[x[0]] + pos_emb[jnp.arange(seq_len)]
    assert out.shape == (seq_len, embedding_dim)
    np.testing.assert_allclose(np.asarray(out), np.asarray(ref), rtol=1e-6, atol=1e-6)

    print("KERNEL_OK")
</pallas_src>

<mosaic_0001>
module attributes {stable_mosaic.version = 11 : i64} {
  func.func @_seq_embed_kernel(%arg0: i32, %arg1: memref<16x1xi32, #tpu.memory_space<vmem>>, %arg2: memref<32x128xf32, #tpu.memory_space<vmem>>, %arg3: memref<16x128xf32, #tpu.memory_space<vmem>>, %arg4: memref<16x128xf32, #tpu.memory_space<vmem>>) attributes {dimension_semantics = [#tpu.dimension_semantics<parallel>], iteration_bounds = array<i64: 1>, scalar_prefetch = 0 : i64, scratch_operands = 0 : i64, tpu.core_type = #tpu.core_type<tc>, window_params = [{transform_indices = @transform_0, window_bounds = array<i64: 16, 1>}, {pipeline_mode = #tpu.pipeline_mode<synchronous>, transform_indices = @transform_1, window_bounds = array<i64: 32, 128>}, {transform_indices = @transform_2, window_bounds = array<i64: 16, 128>}, {transform_indices = @transform_3, window_bounds = array<i64: 16, 128>}]} {
    %c0 = arith.constant 0 : index
    %c0_0 = arith.constant 0 : index
    %0 = vector.load %arg1[%c0, %c0_0] : memref<16x1xi32, #tpu.memory_space<vmem>>, vector<16x1xi32>
    %1 = tpu.iota {dimensions = array<i32: 1>} : vector<16x32xi32>
    %2 = vector.broadcast %0 : vector<16x1xi32> to vector<16x32xi32>
    %3 = arith.cmpi eq, %2, %1 : vector<16x32xi32>
    %4 = arith.extui %3 : vector<16x32xi1> to vector<16x32xi32>
    %5 = arith.sitofp %4 : vector<16x32xi32> to vector<16x32xf32>
    %c0_1 = arith.constant 0 : index
    %c0_2 = arith.constant 0 : index
    %6 = vector.load %arg2[%c0_1, %c0_2] : memref<32x128xf32, #tpu.memory_space<vmem>>, vector<32x128xf32>
    %cst = arith.constant dense<0.000000e+00> : vector<16x128xf32>
    %7 = tpu.matmul %5, %6, %cst {dimension_numbers = #tpu.dot_dimension_numbers<[1], [0], [0], [1], [0, 0, 1, 1], [], []>} : vector<16x32xf32>, vector<32x128xf32>, vector<16x128xf32> -> vector<16x128xf32>
    %c0_3 = arith.constant 0 : index
    %c0_4 = arith.constant 0 : index
    %8 = vector.load %arg3[%c0_3, %c0_4] : memref<16x128xf32, #tpu.memory_space<vmem>>, vector<16x128xf32>
    %9 = arith.addf %7, %8 : vector<16x128xf32>
    %c0_5 = arith.constant 0 : index
    %c0_6 = arith.constant 0 : index
    %10 = vector.load %arg4[%c0_5, %c0_6] : memref<16x128xf32, #tpu.memory_space<vmem>>, vector<16x128xf32>
    tpu.vector_store %arg4[%c0_5, %c0_6], %9 {strides = array<i32>} : memref<16x128xf32, #tpu.memory_space<vmem>>, vector<16x128xf32>,
    return
  }
  func.func @transform_0(%arg0: i32) -> (i32, i32) {
    %c0_i32 = arith.constant 0 : i32
    %c0_i32_0 = arith.constant 0 : i32
    return %arg0, %c0_i32 : i32, i32
  }
  func.func @transform_1(%arg0: i32) -> (i32, i32) {
    %c0_i32 = arith.constant 0 : i32
    %c0_i32_0 = arith.constant 0 : i32
    %c0_i32_1 = arith.constant 0 : i32
    return %c0_i32, %c0_i32_0 : i32, i32
  }
  func.func @transform_2(%arg0: i32) -> (i32, i32) {
    %c0_i32 = arith.constant 0 : i32
    %c0_i32_0 = arith.constant 0 : i32
    return %arg0, %c0_i32 : i32, i32
  }
  func.func @transform_3(%arg0: i32) -> (i32, i32) {
    %c0_i32 = arith.constant 0 : i32
    %c0_i32_0 = arith.constant 0 : i32
    return %arg0, %c0_i32 : i32, i32
  }
}

</mosaic_0001>

<bundles_post_ra>
// kernel: tpu_custom_call.1
= control target key start
LH: loop header
LB: loop body
LE: loop exit
PB: predicated region body
PF: predicated region fallthrough
CT: control target
= control target key end

     0   :  { %8 = vsyncpa [#allocation3], 0  ;;  %s221_s0 = inlined_call_operand.vmem [shape: s32[16,1], index: 0, kind: input, shape index: {}]   ;;  %s222_s1 = inlined_call_operand.hbm [shape: f32[32,128], index: 1, kind: input, shape index: {}]   ;;  %s223_s2 = inlined_call_operand.vmem [shape: f32[16,128], index: 2, kind: input, shape index: {}]   ;;  %s224_s3 = inlined_call_operand.hbm [shape: f32[16,128], index: 3, kind: output, shape index: {}]  }
   0x1   :  { %9 = vsyncpa [#allocation4], 0  ;;  %s16_s14 = sshll.u32 %s222_s1, 4  ;;  %s171_s15 = smov [#allocation2]   ;;  %s17_s14 = int_to_ptr.hbm [resolvable:$true] %s16_s14 }
   0x2   :  { %s18_s16 = sshll.u32 %s171_s15, 4  ;;  %s172_s17 = smov 128   ;;  %s19_s16 = int_to_ptr.vmem [resolvable:$true] %s18_s16 }
   0x3   :  { %s173_s18 = smov 8  }
   0x4   :  { %24 = dma.hbm_to_vmem [thread:$0]  %s17_s14, 512, %s19_s16, [#allocation3], %s172_s17, %s172_s17, %s173_s18  }
   0x5   :  { %167 = dma.done.wait [#allocation3], 512  }
   0x6   :  { %168 = vsyncadd [#allocation3], 4294966784  ;;  %v174_v0 = vmov 0   ;;  %v31_v1 = vld [vmem:[%s221_s0] sm:$0xff]  ;;  %v50_v2 = vld [vmem:[#allocation2 + $0x18] sm:$0xff]  ;;  %v33_v7 = vlaneseq  ;;  %vm53_vm0 = vcmask 261120  }
   0x7   :  { %118 = vset.pattern.permute.xlu0 %v174_v0  ;;  %72 = vmatpush.msra.mxu0 %v50_v2  ;;  %v49_v3 = vld [vmem:[#allocation2 + $0x10] sm:$0xff]  ;;  %v48_v4 = vld [vmem:[#allocation2 + $0x8] sm:$0xff]  ;;  %v47_v6 = vld [vmem:[#allocation2] sm:$0xff]  ;;  %v175_v10 = vmov 0.0   ;;  %s176_s25 = smov [#allocation5]   ;;  %s91_s29 = sshll.u32 %s224_s3, 4  ;;  %s92_s29 = int_to_ptr.hbm [resolvable:$true] %s91_s29 }
   0x8   :  { %36 = vperm.xlu0 %118, %v31_v1   ;;  %108 = vmatpush.msra.mxu1 %v50_v2  ;;  %v32_v5 = vld [vmem:[%s221_s0 + $0x8] sm:$0xff]  ;;  %v34_v8 = vand.u32 127, %v33_v7  ;;  %v51_v14 = vld [vmem:[%s223_s2] sm:$0xff]  ;;  %s89_s26 = sshll.u32 %s176_s25, 4  ;;  %s90_s26 = int_to_ptr.vmem [resolvable:$true] %s89_s26 }
   0x9   :  { %73 = vmatpush.msra.mxu0 %v49_v3  ;;  %v52_v17 = vld [vmem:[%s223_s2 + $0x8] sm:$0xff] }
   0xa   :  { %109 = vmatpush.msra.mxu1 %v49_v3 }
   0xb   :  { %74 = vmatpush.msra.mxu0 %v48_v4 }
   0xc   :  { %110 = vmatpush.msra.mxu1 %v48_v4 }
   0xd   :  { %75 = vmatpush.msra.mxu0 %v47_v6 }
   0xe   :  { %111 = vmatpush.msra.mxu1 %v47_v6 }
  0x10   :  { %39 = vperm.xlu0 %118, %v32_v5  }
  0x7a   :  { %v37_v9 = vpop.permute.xlu0 %36 }
  0x7b   :  { %vm41_vm1 = vcmp.eq.s32.totalorder %v37_v9, %v34_v8 }
  0x7c   :  { %v104_v11 = vsel %vm41_vm1, 1.0, %v175_v10 }
  0x7d   :  { %106 = vmatmul.msk.f32.vlgmr.msra.gmra.mxu0 %vm53_vm0, %v104_v11 }
  0x82   :  { %v40_v12 = vpop.permute.xlu0 %39 }
  0x83   :  { %vm42_vm2 = vcmp.eq.s32.totalorder %v40_v12, %v34_v8 }
  0x84   :  { %v105_v13 = vsel %vm42_vm2, 1.0, %v175_v10 }
  0x85   :  { %107 = vmatmul.msk.f32.vlgmr.msra.gmra.mxu1 %vm53_vm0, %v105_v13 }
  0xfa   :  { %v77_v15 = vpop.f32.mrf.mxu0 }
  0xfb   :  { %v78_v16 = vadd.f32 %v77_v15, %v51_v14 }
  0xfd   :  { %83 = vst [vmem:[#allocation5] sm:$0xff] %v78_v16 }
 0x102   :  { %v80_v18 = vpop.f32.mrf.mxu1 }
 0x103   :  { %v81_v19 = vadd.f32 %v80_v18, %v52_v17 }
 0x105   :  { %84 = vst [vmem:[#allocation5 + $0x8] sm:$0xff] %v81_v19 }
 0x106   :  { %97 = dma.vmem_to_hbm [thread:$0]  %s90_s26, 256, %s92_s29, [#allocation4], %s172_s17, %s172_s17, %s173_s18  }
 0x107   :  { %169 = dma.done.wait [#allocation4], 256  }
 0x108   :  { %170 = vsyncadd [#allocation4], 4294967040 }
 0x109   :  { %102 = vsyncpa [#allocation3], 1 }
 0x10a   :  { %103 = vsyncpa [#allocation4], 1 }

</bundles_post_ra>
